<compile_context>
chip_gen: v6e
topology: v6e:2x2x1
jax: 0.10.0
libtpu: 0.0.40
codegen_flags: <defaults>
</compile_context>

<pallas_src>
import jax
import jax.numpy as jnp
from jax.experimental import pallas as pl
from jax.experimental.pallas import tpu as pltpu


def _round_up(x, m):
    return ((x + m - 1) // m) * m


def _tpu_generation_defaults():
    """Returns (tn, tk, vmem_limit_bytes) tuned per TPU generation."""
    kind = ""
    try:
        kind = jax.devices()[0].device_kind.lower()
    except Exception:
        pass
    if "v5 lite" in kind or "v5e" in kind or "v5litepod" in kind:
        return 256, 2048, 100 * 1024 * 1024
    if "v6" in kind:
        return 512, 512, 100 * 1024 * 1024
    if "v7" in kind:
        return 512, 256, 56 * 1024 * 1024
    # Unknown generation: conservative settings that fit every gen's VMEM.
    return 256, 512, 48 * 1024 * 1024


# ----------------------------------------------------------------------------- kernel bodies

def _jumprelu_body(x_ref, w_enc_ref, enc_ref, w_dec_ref, b_dec_ref,
                   out_ref, acc_ref, *, accumulate_in_out):
    k = pl.program_id(1)

    @pl.when(k == 0)
    def _init():
        acc_ref[...] = jnp.zeros_like(acc_ref)

    # ---- encode (this d_sae chunk): pre = x @ W_enc[:, chunk] + b_enc[chunk]  (f32 acc) ----
    pre = jnp.dot(x_ref[...], w_enc_ref[...],
                  preferred_element_type=jnp.float32)            # (tn, tk) f32
    pre = pre + enc_ref[0:1, :]                                  # + b_enc  (1, tk) bcast

    # ---- JumpReLU: threshold arrives pre-clamped, so one compare + one select ----
    acts = jnp.where(pre > enc_ref[1:2, :], pre, 0.0)            # (tn, tk) f32

    # ---- decode partial: acc += acts @ W_dec[chunk, :]  (bf16 MXU, f32 accumulate) ----
    acc_ref[...] += jnp.dot(acts.astype(w_dec_ref.dtype), w_dec_ref[...],
                            preferred_element_type=jnp.float32)  # (tn, d_model)

    @pl.when(k == pl.num_programs(1) - 1)
    def _finalize():
        if accumulate_in_out:
            out_ref[...] += b_dec_ref[...]
        else:
            out_ref[...] = (acc_ref[...] + b_dec_ref[...]).astype(out_ref.dtype)


def _kernel_acc_in_out(x_ref, w_enc_ref, enc_ref, w_dec_ref, b_dec_ref, out_ref):
    # f32 output: accumulate directly into the resident output block (no scratch).
    _jumprelu_body(x_ref, w_enc_ref, enc_ref, w_dec_ref, b_dec_ref,
                   out_ref, out_ref, accumulate_in_out=True)


def _kernel_with_scratch(x_ref, w_enc_ref, enc_ref, w_dec_ref, b_dec_ref, out_ref, acc_ref):
    # non-f32 output: keep a persistent f32 VMEM accumulator, cast on finalize.
    _jumprelu_body(x_ref, w_enc_ref, enc_ref, w_dec_ref, b_dec_ref,
                   out_ref, acc_ref, accumulate_in_out=False)


# ----------------------------------------------------------------------------- param prep

def prepare_jumprelu_params(w_enc, b_enc, threshold, w_dec, b_dec, *,
                            tk=None, compute_dtype=jnp.bfloat16):
    """Pad / cast SAE parameters ONCE (call at parameter-prep time, not per forward).

    Padded d_sae columns have W_enc=0, b_enc=0, clamped threshold=0 -> pre=0, acts=0;
    padded W_dec rows are 0, so padding is numerically exact.
    """
    d_model, d_sae = w_enc.shape
    _tn_def, tk_def, _vmem_def = _tpu_generation_defaults()
    if tk is None:
        tk = tk_def

    d_model_p = _round_up(d_model, 128)
    tk_eff = max(128, min(tk, _round_up(d_sae, 128)))
    d_sae_p = _round_up(d_sae, tk_eff)

    def pad2d(a, shape, dtype):
        a = a.astype(dtype)
        if a.shape == shape:
            return a                                   # pass-through, no HBM copy
        return jnp.zeros(shape, dtype).at[:a.shape[0], :a.shape[1]].set(a)

    w_enc_p = pad2d(w_enc, (d_model_p, d_sae_p), compute_dtype)
    w_dec_p = pad2d(w_dec, (d_sae_p, d_model_p), compute_dtype)

    # Pack b_enc (row 0) and the PRE-CLAMPED threshold (row 1) into one small array.
    enc_p = jnp.zeros((2, d_sae_p), jnp.float32)
    enc_p = enc_p.at[0, :d_sae].set(b_enc.astype(jnp.float32))
    enc_p = enc_p.at[1, :d_sae].set(jnp.maximum(threshold.astype(jnp.float32), 0.0))

    b_dec_p = jnp.zeros((1, d_model_p), jnp.float32).at[0, :d_model].set(
        b_dec.astype(jnp.float32))

    return dict(w_enc=w_enc_p, enc=enc_p, w_dec=w_dec_p, b_dec=b_dec_p,
                d_model=d_model, d_sae=d_sae, d_model_p=d_model_p, d_sae_p=d_sae_p,
                tk=tk_eff, compute_dtype=compute_dtype)


# ----------------------------------------------------------------------------- forward

def jumprelu_sae_forward(x, params, *, tn=None, out_dtype=None, vmem_limit_bytes=None):
    """x: (N, d_model) activations; params: output of prepare_jumprelu_params."""
    N, d_model = x.shape
    assert d_model == params["d_model"], "d_model mismatch vs prepared params"

    tn_def, _tk_def, vmem_def = _tpu_generation_defaults()
    if tn is None:
        tn = tn_def
    if vmem_limit_bytes is None:
        vmem_limit_bytes = vmem_def
    out_dtype = jnp.dtype(x.dtype if out_dtype is None else out_dtype)

    compute_dtype = params["compute_dtype"]
    d_model_p = params["d_model_p"]
    d_sae_p = params["d_sae_p"]
    tk_eff = params["tk"]

    tn_eff = max(8, min(tn, _round_up(N, 8)))
    n_pad = _round_up(N, tn_eff)

    if (N, d_model) == (n_pad, d_model_p) and x.dtype == compute_dtype:
        xp = x                                          # pass-through, no per-call pad
    else:
        xp = jnp.zeros((n_pad, d_model_p), compute_dtype).at[:N, :d_model].set(
            x.astype(compute_dtype))

    grid = (n_pad // tn_eff, d_sae_p // tk_eff)

    in_specs = [
        pl.BlockSpec((tn_eff, d_model_p), lambda i, k: (i, 0)),   # x tile (k-invariant)
        pl.BlockSpec((d_model_p, tk_eff), lambda i, k: (0, k)),   # W_enc chunk
        pl.BlockSpec((2, tk_eff),         lambda i, k: (0, k)),   # [b_enc; clamped thr]
        pl.BlockSpec((tk_eff, d_model_p), lambda i, k: (k, 0)),   # W_dec chunk
        pl.BlockSpec((1, d_model_p),      lambda i, k: (0, 0)),   # b_dec
    ]
    out_spec = pl.BlockSpec((tn_eff, d_model_p), lambda i, k: (i, 0))

    acc_in_out = out_dtype == jnp.dtype(jnp.float32)
    if acc_in_out:
        kernel = _kernel_acc_in_out
        scratch_shapes = []
    else:
        kernel = _kernel_with_scratch
        scratch_shapes = [pltpu.VMEM((tn_eff, d_model_p), jnp.float32)]

    out = pl.pallas_call(
        kernel,
        out_shape=jax.ShapeDtypeStruct((n_pad, d_model_p), out_dtype),
        grid_spec=pltpu.PrefetchScalarGridSpec(
            num_scalar_prefetch=0,
            grid=grid,
            in_specs=in_specs,
            out_specs=out_spec,
            scratch_shapes=scratch_shapes),
        compiler_params=pltpu.CompilerParams(
            dimension_semantics=("parallel", "arbitrary"),
            vmem_limit_bytes=vmem_limit_bytes),
    )(xp, params["w_enc"], params["enc"], params["w_dec"], params["b_dec"])

    if (n_pad, d_model_p) != (N, d_model):
        out = out[:N, :d_model]
    return out


def jumprelu_sae(x, w_enc, b_enc, threshold, w_dec, b_dec, *,
                 tn=None, tk=None, compute_dtype=jnp.bfloat16, out_dtype=None):
    """Convenience one-shot wrapper (prefer prepare_jumprelu_params + jumprelu_sae_forward
    when calling repeatedly with the same weights)."""
    params = prepare_jumprelu_params(w_enc, b_enc, threshold, w_dec, b_dec,
                                     tk=tk, compute_dtype=compute_dtype)
    return jumprelu_sae_forward(x, params, tn=tn, out_dtype=out_dtype)


if __name__ == "__main__":
    # Small shapes consistent with the module: d_model=128, d_sae=256, N=16 tokens.
    d_model, d_sae, N = 128, 256, 16

    key = jax.random.PRNGKey(0)
    k_x, k_we, k_be, k_th, k_wd, k_bd = jax.random.split(key, 6)

    x = jax.random.normal(k_x, (N, d_model), dtype=jnp.float32)
    W_enc = jax.random.normal(k_we, (d_model, d_sae), dtype=jnp.float32) * 0.05
    b_enc = jax.random.normal(k_be, (d_sae,), dtype=jnp.float32) * 0.1
    threshold = jnp.abs(jax.random.normal(k_th, (d_sae,), dtype=jnp.float32)) * 0.1
    W_dec = jax.random.normal(k_wd, (d_sae, d_model), dtype=jnp.float32) * 0.05
    b_dec = jax.random.normal(k_bd, (d_model,), dtype=jnp.float32) * 0.1

    params = prepare_jumprelu_params(W_enc, b_enc, threshold, W_dec, b_dec)
    out = jumprelu_sae_forward(x, params)
    out = jax.block_until_ready(out)
    assert out.shape == (N, d_model)
    assert out.dtype == jnp.float32

    # Reference mirroring the kernel numerics (bf16 MXU operands, f32 accumulation,
    # f32 JumpReLU) so the tolerance only covers accumulation-order differences.
    xb = x.astype(jnp.bfloat16)
    pre = jnp.dot(xb, W_enc.astype(jnp.bfloat16),
                  preferred_element_type=jnp.float32) + b_enc
    acts = jnp.where(pre > jnp.maximum(threshold, 0.0), pre, 0.0)
    ref = jnp.dot(acts.astype(jnp.bfloat16), W_dec.astype(jnp.bfloat16),
                  preferred_element_type=jnp.float32) + b_dec
    assert jnp.allclose(out, ref, atol=1e-2, rtol=1e-2), "mismatch vs bf16/f32 reference"

    # Loose sanity check against the pure-f32 PyTorch semantics.
    pre32 = x @ W_enc + b_enc
    ref32 = ((pre32 > threshold) * jnp.maximum(pre32, 0.0)) @ W_dec + b_dec
    assert jnp.allclose(out, ref32, atol=5e-2, rtol=5e-2), "mismatch vs f32 reference"

    print("KERNEL_OK")
</pallas_src>

<mosaic_0001>
module attributes {stable_mosaic.version = 11 : i64} {
  func.func @_kernel_acc_in_out(%arg0: i32, %arg1: i32, %arg2: memref<16x128xbf16, #tpu.memory_space<vmem>>, %arg3: memref<128x256xbf16, #tpu.memory_space<vmem>>, %arg4: memref<2x256xf32, #tpu.memory_space<vmem>>, %arg5: memref<256x128xbf16, #tpu.memory_space<vmem>>, %arg6: memref<1x128xf32, #tpu.memory_space<vmem>>, %arg7: memref<16x128xf32, #tpu.memory_space<vmem>>) attributes {dimension_semantics = [#tpu.dimension_semantics<parallel>, #tpu.dimension_semantics<arbitrary>], iteration_bounds = array<i64: 1, 1>, scalar_prefetch = 0 : i64, scratch_operands = 0 : i64, tpu.core_type = #tpu.core_type<tc>, window_params = [{transform_indices = @transform_0, window_bounds = array<i64: 16, 128>}, {transform_indices = @transform_1, window_bounds = array<i64: 128, 256>}, {transform_indices = @transform_2, window_bounds = array<i64: 2, 256>}, {transform_indices = @transform_3, window_bounds = array<i64: 256, 128>}, {pipeline_mode = #tpu.pipeline_mode<synchronous>, transform_indices = @transform_4, window_bounds = array<i64: 1, 128>}, {transform_indices = @transform_5, window_bounds = array<i64: 16, 128>}]} {
    %c0_i32 = arith.constant 0 : i32
    %0 = arith.cmpi eq, %arg1, %c0_i32 : i32
    %1 = arith.extui %0 : i1 to i32
    %c0_i32_0 = arith.constant 0 : i32
    %2 = arith.cmpi ne, %1, %c0_i32_0 : i32
    scf.if %2 {
      %cst_17 = arith.constant 0.000000e+00 : f32
      %23 = vector.broadcast %cst_17 : f32 to vector<16x128xf32>
      %c0_18 = arith.constant 0 : index
      %c0_19 = arith.constant 0 : index
      %24 = vector.load %arg7[%c0_18, %c0_19] : memref<16x128xf32, #tpu.memory_space<vmem>>, vector<16x128xf32>
      tpu.vector_store %arg7[%c0_18, %c0_19], %23 {strides = array<i32>} : memref<16x128xf32, #tpu.memory_space<vmem>>, vector<16x128xf32>,
    } else {
    }
    %c0 = arith.constant 0 : index
    %c0_1 = arith.constant 0 : index
    %3 = vector.load %arg2[%c0, %c0_1] : memref<16x128xbf16, #tpu.memory_space<vmem>>, vector<16x128xbf16>
    %c0_2 = arith.constant 0 : index
    %c0_3 = arith.constant 0 : index
    %4 = vector.load %arg3[%c0_2, %c0_3] : memref<128x256xbf16, #tpu.memory_space<vmem>>, vector<128x256xbf16>
    %cst = arith.constant dense<0.000000e+00> : vector<16x256xf32>
    %5 = tpu.matmul %3, %4, %cst {dimension_numbers = #tpu.dot_dimension_numbers<[1], [0], [0], [1], [0, 0, 1, 1], [], []>} : vector<16x128xbf16>, vector<128x256xbf16>, vector<16x256xf32> -> vector<16x256xf32>
    %c0_4 = arith.constant 0 : index
    %c0_5 = arith.constant 0 : index
    %6 = vector.load %arg4[%c0_4, %c0_5] : memref<2x256xf32, #tpu.memory_space<vmem>>, vector<1x256xf32>
    %7 = vector.broadcast %6 : vector<1x256xf32> to vector<16x256xf32>
    %8 = arith.addf %5, %7 : vector<16x256xf32>
    %c1 = arith.constant 1 : index
    %c0_6 = arith.constant 0 : index
    %9 = vector.load %arg4[%c1, %c0_6] : memref<2x256xf32, #tpu.memory_space<vmem>>, vector<1x256xf32>
    %10 = vector.broadcast %9 : vector<1x256xf32> to vector<16x256xf32>
    %11 = arith.cmpf ogt, %8, %10 : vector<16x256xf32>
    %cst_7 = arith.constant 0.000000e+00 : f32
    %12 = vector.broadcast %cst_7 : f32 to vector<16x256xf32>
    %13 = arith.select %11, %8, %12 : vector<16x256xi1>, vector<16x256xf32>
    %c0_8 = arith.constant 0 : index
    %c0_9 = arith.constant 0 : index
    %14 = vector.load %arg7[%c0_8, %c0_9] : memref<16x128xf32, #tpu.memory_space<vmem>>, vector<16x128xf32>
    %15 = arith.truncf %13 : vector<16x256xf32> to vector<16x256xbf16>
    %c0_10 = arith.constant 0 : index
    %c0_11 = arith.constant 0 : index
    %16 = vector.load %arg5[%c0_10, %c0_11] : memref<256x128xbf16, #tpu.memory_space<vmem>>, vector<256x128xbf16>
    %cst_12 = arith.constant dense<0.000000e+00> : vector<16x128xf32>
    %17 = tpu.matmul %15, %16, %cst_12 {dimension_numbers = #tpu.dot_dimension_numbers<[1], [0], [0], [1], [0, 0, 1, 1], [], []>} : vector<16x256xbf16>, vector<256x128xbf16>, vector<16x128xf32> -> vector<16x128xf32>
    %18 = arith.addf %14, %17 : vector<16x128xf32>
    %c0_13 = arith.constant 0 : index
    %c0_14 = arith.constant 0 : index
    %19 = vector.load %arg7[%c0_13, %c0_14] : memref<16x128xf32, #tpu.memory_space<vmem>>, vector<16x128xf32>
    tpu.vector_store %arg7[%c0_13, %c0_14], %18 {strides = array<i32>} : memref<16x128xf32, #tpu.memory_space<vmem>>, vector<16x128xf32>,
    %c0_i32_15 = arith.constant 0 : i32
    %20 = arith.cmpi eq, %arg1, %c0_i32_15 : i32
    %21 = arith.extui %20 : i1 to i32
    %c0_i32_16 = arith.constant 0 : i32
    %22 = arith.cmpi ne, %21, %c0_i32_16 : i32
    scf.if %22 {
      %c0_17 = arith.constant 0 : index
      %c0_18 = arith.constant 0 : index
      %23 = vector.load %arg7[%c0_17, %c0_18] : memref<16x128xf32, #tpu.memory_space<vmem>>, vector<16x128xf32>
      %c0_19 = arith.constant 0 : index
      %c0_20 = arith.constant 0 : index
      %24 = vector.load %arg6[%c0_19, %c0_20] : memref<1x128xf32, #tpu.memory_space<vmem>>, vector<1x128xf32>
      %25 = vector.broadcast %24 : vector<1x128xf32> to vector<16x128xf32>
      %26 = arith.addf %23, %25 : vector<16x128xf32>
      %c0_21 = arith.constant 0 : index
      %c0_22 = arith.constant 0 : index
      %27 = vector.load %arg7[%c0_21, %c0_22] : memref<16x128xf32, #tpu.memory_space<vmem>>, vector<16x128xf32>
      tpu.vector_store %arg7[%c0_21, %c0_22], %26 {strides = array<i32>} : memref<16x128xf32, #tpu.memory_space<vmem>>, vector<16x128xf32>,
    } else {
    }
    return
  }
  func.func @transform_0(%arg0: i32, %arg1: i32) -> (i32, i32) {
    %c0_i32 = arith.constant 0 : i32
    %c0_i32_0 = arith.constant 0 : i32
    return %arg0, %c0_i32 : i32, i32
  }
  func.func @transform_1(%arg0: i32, %arg1: i32) -> (i32, i32) {
    %c0_i32 = arith.constant 0 : i32
    %c0_i32_0 = arith.constant 0 : i32
    return %c0_i32, %arg1 : i32, i32
  }
  func.func @transform_2(%arg0: i32, %arg1: i32) -> (i32, i32) {
    %c0_i32 = arith.constant 0 : i32
    %c0_i32_0 = arith.constant 0 : i32
    return %c0_i32, %arg1 : i32, i32
  }
  func.func @transform_3(%arg0: i32, %arg1: i32) -> (i32, i32) {
    %c0_i32 = arith.constant 0 : i32
    %c0_i32_0 = arith.constant 0 : i32
    return %arg1, %c0_i32 : i32, i32
  }
  func.func @transform_4(%arg0: i32, %arg1: i32) -> (i32, i32) {
    %c0_i32 = arith.constant 0 : i32
    %c0_i32_0 = arith.constant 0 : i32
    %c0_i32_1 = arith.constant 0 : i32
    return %c0_i32, %c0_i32_0 : i32, i32
  }
  func.func @transform_5(%arg0: i32, %arg1: i32) -> (i32, i32) {
    %c0_i32 = arith.constant 0 : i32
    %c0_i32_0 = arith.constant 0 : i32
    return %arg0, %c0_i32 : i32, i32
  }
}

</mosaic_0001>

<bundles_post_ra>
// kernel: tpu_custom_call.1
= control target key start
LH: loop header
LB: loop body
LE: loop exit
PB: predicated region body
PF: predicated region fallthrough
CT: control target
= control target key end

     0   :  { %10 = vsyncpa [#allocation3], 0  ;;  %s759_s0 = inlined_call_operand.hbm [shape: bf16[16,128], index: 0, kind: input, shape index: {}]   ;;  %s760_s1 = inlined_call_operand.hbm [shape: bf16[128,256], index: 1, kind: input, shape index: {}]   ;;  %s761_s2 = inlined_call_operand.hbm [shape: f32[2,256], index: 2, kind: input, shape index: {}]   ;;  %s762_s3 = inlined_call_operand.hbm [shape: bf16[256,128], index: 3, kind: input, shape index: {}]   ;;  %s763_s4 = inlined_call_operand.vmem [shape: f32[1,128], index: 4, kind: input, shape index: {}]   ;;  %s764_s5 = inlined_call_operand.hbm [shape: f32[16,128], index: 5, kind: output, shape index: {}]  }
   0x1   :  { %11 = vsyncpa [#allocation6], 0 }
   0x2   :  { %12 = vsyncpa [#allocation9], 0 }
   0x3   :  { %13 = vsyncpa [#allocation4], 0  ;;  %s695_s18 = smov [#allocation5]  }
   0x4   :  { %s31_s19 = sshll.u32 %s695_s18, 4  ;;  %s32_s19 = int_to_ptr.vmem [resolvable:$true] %s31_s19 }
   0x5   :  { %s595_s20 = scalar_lea.vmem %s32_s19, 2048  ;;  %p600_p1 = scmp.lt.s32.totalorder %s32_s19, %s32_s19 }
   0x6   :  { %p596_p0 = scmp.ne.s32.totalorder %s32_s19, %s595_s20  ;;  %p601_p2 = scmp.lt.s32.totalorder %s595_s20, %s595_s20 }
   0x8   :  { %p602_p3 = por %p601_p2, %p600_p1 }
   0xa   :  { %p603_p4 = pnand %p602_p3, %p596_p0 }
   0xc   :  { %606 = shalt.err (!%p603_p4)
}
   0xd   :  { %s696_s21 = smov 128   ;;  %s697_s22 = smov 8  }
   0xe   :  { %37 = dma.hbm_to_vmem [thread:$0]  %s760_s1, 2048, %s32_s19, [#allocation6], %s696_s21, %s696_s21, %s697_s22  }
   0xf   :  { %s698_s25 = smov [#allocation2]  }
  0x10   :  { %s19_s26 = sshll.u32 %s698_s25, 4  ;;  %s20_s26 = int_to_ptr.vmem [resolvable:$true] %s19_s26 }
  0x11   :  { %s615_s27 = scalar_lea.vmem %s20_s26, 128  ;;  %p620_p6 = scmp.lt.s32.totalorder %s20_s26, %s20_s26 }
  0x12   :  { %p616_p5 = scmp.ne.s32.totalorder %s20_s26, %s615_s27  ;;  %p621_p7 = scmp.lt.s32.totalorder %s615_s27, %s615_s27 }
  0x14   :  { %p622_p8 = por %p621_p7, %p620_p6 }
  0x16   :  { %p623_p9 = pnand %p622_p8, %p616_p5 }
  0x18   :  { %626 = shalt.err (!%p623_p9)
}
  0x19   :  { %s699_s28 = smov 64   ;;  %s700_s29 = smov 4  }
  0x1a   :  { %25 = dma.hbm_to_vmem [thread:$0]  %s759_s0, 128, %s20_s26, [#allocation3], %s699_s28, %s699_s28, %s700_s29  }
  0x1b   :  { %s701_s7 = smov [#allocation7]   ;;  %s702_s9 = smov [#allocation8]  }
  0x1c   :  { %s44_s8 = sshll.u32 %s701_s7, 4  ;;  %s53_s1 = sshll.u32 %s702_s9, 4  ;;  %s45_s8 = int_to_ptr.vmem [resolvable:$true] %s44_s8  ;;  %s54_s1 = int_to_ptr.vmem [resolvable:$true] %s53_s1 }
  0x1d   :  { %s635_s10 = scalar_lea.vmem %s45_s8, 64  ;;  %p640_p11 = scmp.lt.s32.totalorder %s45_s8, %s45_s8 }
  0x1e   :  { %p636_p10 = scmp.ne.s32.totalorder %s45_s8, %s635_s10  ;;  %p641_p12 = scmp.lt.s32.totalorder %s635_s10, %s635_s10 }
  0x20   :  { %p642_p13 = por %p641_p12, %p640_p11 }
  0x22   :  { %p643_p0 = pnand %p642_p13, %p636_p10 }
  0x24   :  { %646 = shalt.err (!%p643_p0)
}
  0x25   :  { %47 = dma.hbm_to_vmem [thread:$0]  %s761_s2, 64, %s45_s8, [#allocation6]  }
  0x26   :  { %s655_s13 = scalar_lea.vmem %s54_s1, 2048  ;;  %p660_p2 = scmp.lt.s32.totalorder %s54_s1, %s54_s1 }
  0x27   :  { %p656_p1 = scmp.ne.s32.totalorder %s54_s1, %s655_s13  ;;  %p661_p3 = scmp.lt.s32.totalorder %s655_s13, %s655_s13 }
  0x29   :  { %p662_p4 = por %p661_p3, %p660_p2 }
  0x2b   :  { %p663_p5 = pnand %p662_p4, %p656_p1 }
  0x2d   :  { %666 = shalt.err (!%p663_p5)
}
  0x2e   :  { %59 = dma.hbm_to_vmem [thread:$0]  %s762_s3, 2048, %s54_s1, [#allocation9], %s699_s28, %s699_s28, %s700_s29  }
  0x2f   :  { %687 = dma.done.wait [#allocation3], 128  }
  0x30   :  { %688 = vsyncadd [#allocation3], 4294967168 }
  0x31   :  { %689 = dma.done.wait [#allocation6], 2112  }
  0x32   :  { %690 = vsyncadd [#allocation6], 4294965184 }
  0x33   :  { %691 = dma.done.wait [#allocation9], 2048  }
  0x34   :  { %692 = vsyncadd [#allocation9], 4294965248  ;;  %v703_v0 = vmov 0   ;;  %v546_v1 = vld [vmem:[#allocation5 + $0x74] ss:$8 sps:$4 sm:$0xff]   ;;  %v575_v16 = vld [vmem:[#allocation8 + $0x68] sm:$0xff]   ;;  %v101_v34 = vlaneseq }
  0x35   :  { %229 = vmatprep.mubr.bf16.mxu0 %v703_v0  ;;  %v548_v2 = vld [vmem:[#allocation5 + $0x70] ss:$8 sps:$4 sm:$0xff]   ;;  %197 = vmatprep.subr.bf16.mxu0 %v546_v1  ;;  %v549_v3 = vld [vmem:[#allocation5 + $0x64] ss:$8 sps:$4 sm:$0xff]   ;;  %v551_v4 = vld [vmem:[#allocation5 + $0x60] ss:$8 sps:$4 sm:$0xff]  }
  0x36   :  { %198 = vmatpush1.bf16.msra.mxu0 %v548_v2  ;;  %v552_v5 = vld [vmem:[#allocation5 + $0x54] ss:$8 sps:$4 sm:$0xff]   ;;  %v554_v6 = vld [vmem:[#allocation5 + $0x50] ss:$8 sps:$4 sm:$0xff]   ;;  %v555_v7 = vld [vmem:[#allocation5 + $0x44] ss:$8 sps:$4 sm:$0xff]  }
  0x37   :  { %199 = vmatprep.subr.bf16.mxu0 %v549_v3  ;;  %v557_v8 = vld [vmem:[#allocation5 + $0x40] ss:$8 sps:$4 sm:$0xff]   ;;  %v558_v9 = vld [vmem:[#allocation5 + $0x34] ss:$8 sps:$4 sm:$0xff]   ;;  %v560_v11 = vld [vmem:[#allocation5 + $0x30] ss:$8 sps:$4 sm:$0xff]  }
  0x38   :  { %v571_v10 = vld [vmem:[#allocation8 + $0x78] sm:$0xff]   ;;  %v561_v13 = vld [vmem:[#allocation5 + $0x24] ss:$8 sps:$4 sm:$0xff]   ;;  %v573_v14 = vld [vmem:[#allocation8 + $0x70] sm:$0xff]   ;;  %v102_v35 = vshrl.u32 %v101_v34, 7  ;;  %s704_s15 = smov [#allocation10]  }
  0x39   :  { %v572_v12 = vld [vmem:[#allocation8 + $0x38] sm:$0xff]   ;;  %513 = vmatprep.subr.bf16.mxu1 %v571_v10  ;;  %v574_v15 = vld [vmem:[#allocation8 + $0x30] sm:$0xff]   ;;  %v576_v19 = vld [vmem:[#allocation8 + $0x28] sm:$0xff]   ;;  %s459_s16 = sshll.u32 %s704_s15, 4  ;;  %s460_s16 = int_to_ptr.vmem [resolvable:$true] %s459_s16 }
  0x3a   :  { %200 = vmatpush1.bf16.msra.mxu0 %v551_v4  ;;  %514 = vmatpush3.bf16.msra.mxu1 %v572_v12  ;;  %v563_v17 = vld [vmem:[#allocation5 + $0x20] ss:$8 sps:$4 sm:$0xff]   ;;  %v564_v18 = vld [vmem:[#allocation5 + $0x14] ss:$8 sps:$4 sm:$0xff]   ;;  %v566_v21 = vld [vmem:[#allocation5 + $0x10] ss:$8 sps:$4 sm:$0xff]   ;;  %p672_p7 = scmp.lt.s32.totalorder %s460_s16, %s460_s16 }
  0x3b   :  { %201 = vmatprep.subr.bf16.mxu0 %v552_v5  ;;  %515 = vmatprep.subr.bf16.mxu1 %v573_v14  ;;  %v577_v20 = vld [vmem:[#allocation8 + $0x60] sm:$0xff]   ;;  %v579_v24 = vld [vmem:[#allocation8 + $0x58] sm:$0xff]   ;;  %v581_v28 = vld [vmem:[#allocation8 + $0x50] sm:$0xff]   ;;  %v107_v36 = vsub.s32 1, %v102_v35  ;;  %v103_v37 = vsub.s32 0, %v102_v35  ;;  %s667_s17 = scalar_lea.vmem %s460_s16, 256 }
  0x3c   :  { %v578_v22 = vld [vmem:[#allocation8 + $0x20] sm:$0xff]   ;;  %v580_v26 = vld [vmem:[#allocation8 + $0x18] sm:$0xff]   ;;  %v582_v29 = vld [vmem:[#allocation8 + $0x10] sm:$0xff]   ;;  %p668_p6 = scmp.ne.s32.totalorder %s460_s16, %s667_s17  ;;  %p673_p8 = scmp.lt.s32.totalorder %s667_s17, %s667_s17 }
  0x3d   :  { %v567_v23 = vld [vmem:[#allocation5 + $0x4] ss:$8 sps:$4 sm:$0xff]   ;;  %v569_v25 = vld [vmem:[#allocation5] ss:$8 sps:$4 sm:$0xff]   ;;  %v570_v27 = vld [vmem:[#allocation2] sm:$0xff]  }
  0x3e   :  { %202 = vmatpush1.bf16.msra.mxu0 %v554_v6  ;;  %516 = vmatpush3.bf16.msra.mxu1 %v574_v15  ;;  %v583_v30 = vld [vmem:[#allocation8 + $0x48] sm:$0xff]   ;;  %v585_v32 = vld [vmem:[#allocation8 + $0x40] sm:$0xff]   ;;  %v99_v38 = vld [vmem:[#allocation7] ss:$2 sm:$0x3]  ;;  %p674_p9 = por %p673_p8, %p672_p7 }
  0x3f   :  { %203 = vmatprep.subr.bf16.mxu0 %v555_v7  ;;  %517 = vmatprep.subr.bf16.mxu1 %v575_v16  ;;  %v584_v31 = vld [vmem:[#allocation8 + $0x8] sm:$0xff]   ;;  %v586_v33 = vld [vmem:[#allocation8] sm:$0xff]   ;;  %v108_v40 = vrot.slane %v99_v38, %v107_v36  ;;  %v104_v41 = vrot.slane %v99_v38, %v103_v37  ;;  %v241_v43 = vld [vmem:[#allocation7 + $0x1] ss:$2 sm:$0x3] }
  0x40   :  { %v250_v47 = vrot.slane %v241_v43, %v107_v36  ;;  %v246_v49 = vrot.slane %v241_v43, %v103_v37  ;;  %v512_v58 = vld [vmem:[%s763_s4] ss:$0 sm:$0xff]  ;;  %p675_p10 = pnand %p674_p9, %p668_p6 }
  0x42   :  { %204 = vmatpush1.bf16.msra.mxu0 %v557_v8  ;;  %518 = vmatpush3.bf16.msra.mxu1 %v576_v19 }
  0x43   :  { %205 = vmatprep.subr.bf16.mxu0 %v558_v9  ;;  %519 = vmatprep.subr.bf16.mxu1 %v577_v20 }
  0x46   :  { %206 = vmatpush1.bf16.msra.mxu0 %v560_v11  ;;  %520 = vmatpush3.bf16.msra.mxu1 %v578_v22 }
  0x47   :  { %207 = vmatprep.subr.bf16.mxu0 %v561_v13  ;;  %521 = vmatprep.subr.bf16.mxu1 %v579_v24 }
  0x4a   :  { %208 = vmatpush1.bf16.msra.mxu0 %v563_v17  ;;  %522 = vmatpush3.bf16.msra.mxu1 %v580_v26 }
  0x4b   :  { %209 = vmatprep.subr.bf16.mxu0 %v564_v18  ;;  %523 = vmatprep.subr.bf16.mxu1 %v581_v28 }
  0x4e   :  { %210 = vmatpush1.bf16.msra.mxu0 %v566_v21  ;;  %524 = vmatpush3.bf16.msra.mxu1 %v582_v29 }
  0x4f   :  { %211 = vmatprep.subr.bf16.mxu0 %v567_v23  ;;  %525 = vmatprep.subr.bf16.mxu1 %v583_v30 }
  0x52   :  { %212 = vmatpush1.bf16.msra.mxu0 %v569_v25  ;;  %526 = vmatpush3.bf16.msra.mxu1 %v584_v31 }
  0x53   :  { %527 = vmatprep.subr.bf16.mxu1 %v585_v32 }
  0x55   :  { %230 = vmatmul.mubr.bf16.vlgmr.msra.gmra.mxu0 %v570_v27 }
  0x56   :  { %528 = vmatpush3.bf16.msra.mxu1 %v586_v33 }
 0x115   :  { %v231_v39 = vpop.f32.mrf.mxu0 }
 0x116   :  { %v232_v48 = vadd.f32 %v231_v39, %v104_v41 }
 0x117   :  { %v233_v42 = vpop.f32.mrf.mxu0 }
 0x118   :  { %v234_v45 = vadd.f32 %v233_v42, %v108_v40  ;;  %vm253_vm3 = vcmp.gt.f32.partialorder %v232_v48, %v246_v49 }
 0x119   :  { %v235_v44 = vpop.f32.mrf.mxu0 }
 0x11a   :  { %v236_v46 = vadd.f32 %v235_v44, %v104_v41  ;;  %vm254_vm1 = vcmp.gt.f32.partialorder %v234_v45, %v250_v47 }
 0x11b   :  { %v237_v50 = vpop.f32.mrf.mxu0 }
 0x11c   :  { %v238_v51 = vadd.f32 %v237_v50, %v108_v40  ;;  %vm255_vm0 = vcmp.gt.f32.partialorder %v236_v46, %v246_v49  ;;  %v510_v53 = vpack.c.bf16 %v236_v46, %v232_v48 }
 0x11d   :  { %vm509_vm5 = vmpackc.low %vm255_vm0, %vm253_vm3 }
 0x11e   :  { %vm256_vm2 = vcmp.gt.f32.partialorder %v238_v51, %v250_v47  ;;  %v507_v52 = vpack.c.bf16 %v238_v51, %v234_v45 }
 0x11f   :  { %vm506_vm4 = vmpackc.low %vm256_vm2, %vm254_vm1 }
 0x120   :  { %508 = vmatprep.mubr.msk.bf16.mxu1 %vm506_vm4, %v507_v52 }
 0x121   :  { %511 = vmatmul.mubr.msk.bf16.vlgmr.msra.gmra.mxu1 %vm509_vm5, %v510_v53 }
 0x1e1   :  { %v529_v54 = vpop.f32.mrf.mxu1 }
 0x1e3   :  { %v530_v55 = vpop.f32.mrf.mxu1 }
 0x1e4   :  { %v531_v56 = vadd.f32 %v530_v55, %v529_v54 }
 0x1e5   :  { %v532_v57 = vpop.f32.mrf.mxu1 }
 0x1e6   :  { %v450_v61 = vadd.f32 %v531_v56, %v512_v58 }
 0x1e7   :  { %v533_v59 = vpop.f32.mrf.mxu1 }
 0x1e8   :  { %v534_v60 = vadd.f32 %v533_v59, %v532_v57  ;;  %452 = vst [vmem:[#allocation10] sm:$0xff] %v450_v61 }
 0x1ea   :  { %v451_v62 = vadd.f32 %v534_v60, %v512_v58 }
 0x1ec   :  { %453 = vst [vmem:[#allocation10 + $0x8] sm:$0xff] %v451_v62 }
 0x1ed   :  { %678 = shalt.err (!%p675_p10)
}
 0x1ee   :  { %465 = dma.vmem_to_hbm [thread:$0]  %s460_s16, 256, %s764_s5, [#allocation4], %s696_s21, %s696_s21, %s697_s22  }
 0x1ef   :  { %693 = dma.done.wait [#allocation4], 256  }
 0x1f0   :  { %694 = vsyncadd [#allocation4], 4294967040 }
 0x1f1   :  { %469 = vsyncpa [#allocation3], 1 }
 0x1f2   :  { %470 = vsyncpa [#allocation6], 1 }
 0x1f3   :  { %471 = vsyncpa [#allocation9], 1 }
 0x1f4   :  { %472 = vsyncpa [#allocation4], 1 }

</bundles_post_ra>
